<compile_context>
chip_gen: v5e
topology: v5e:2x2
jax: 0.10.0
libtpu: 0.0.40
codegen_flags: <defaults>
</compile_context>

<pallas_src>
import numpy as np
import jax
import jax.numpy as jnp
from jax.experimental import pallas as pl
from jax.experimental.pallas import tpu as pltpu


def _round_up(x, m):
    return ((x + m - 1) // m) * m


# ----------------------------------------------------------------------------
# Pallas kernel: batched quaternion lookup, single grid step.
#   fid_ref : (B,)  int32 in SMEM (scalar prefetch)
#   pose_ref: (F, 8, Jp) float32, fully VMEM-resident (rows 0..2 = components)
#   out_ref : (B, 4, Jp) float32, lane-dense (Jp multiple of 128)
# ----------------------------------------------------------------------------
def _quaternion_kernel(fid_ref, pose_ref, out_ref):
    B = out_ref.shape[0]
    F = pose_ref.shape[0]
    # TODO(synk): for very large B, chunk over a grid axis instead of fully
    # unrolling this loop (keeps compile time bounded).
    for b in range(B):  # static unroll; b is a Python int at trace time
        # Guard against out-of-range frame ids (torch would raise an
        # IndexError; an unchecked dynamic VMEM index would read garbage).
        fid = jnp.clip(fid_ref[b], 0, F - 1)
        p8 = pose_ref[fid]                                   # (8, Jp) aligned tile
        p = p8[0:3, :]                                       # (3, Jp)
        norm2 = (p[0:1, :] * p[0:1, :]
                 + p[1:2, :] * p[1:2, :]
                 + p[2:3, :] * p[2:3, :])                    # (1, Jp) — pure VPU
        ws = jnp.sqrt(jnp.maximum(1.0 - norm2, 0.0))         # matches torch clamp
        out_ref[b, 0:1, :] = ws                              # static slice stores,
        out_ref[b, 1:4, :] = p                               # no concat / XLU


# ----------------------------------------------------------------------------
# Jitted pallas_call wrapper (lane-dense output, zero post-processing).
# ----------------------------------------------------------------------------
@jax.jit
def _quaternion_forward_lanes(pose_t, frame_ids):
    # pose_t: (F, 8, Jp) f32, frame_ids: (B,) i32  ->  (B, 4, Jp) f32
    F, _, Jp = pose_t.shape
    B = frame_ids.shape[0]

    pose_bytes = F * 8 * Jp * 4
    out_bytes = B * 4 * Jp * 4
    # Residency budget: double-buffered blocks + headroom; keep within the
    # v7x 64 MiB physical ceiling, never below the v5e 16 MiB scoped default.
    vmem_limit = min(max(2 * (pose_bytes + out_bytes) + (1 << 20), 16 << 20),
                     64 << 20)
    # TODO(synk): if F*8*Jp*4 ever exceeds the VMEM budget, fall back to a
    # manual 2-slot make_async_copy per-frame gather instead of full residency.

    return pl.pallas_call(
        _quaternion_kernel,
        out_shape=jax.ShapeDtypeStruct((B, 4, Jp), jnp.float32),
        grid_spec=pltpu.PrefetchScalarGridSpec(
            num_scalar_prefetch=1,
            grid=(1,),
            in_specs=[pl.BlockSpec((F, 8, Jp), lambda i, fid: (0, 0, 0))],
            out_specs=pl.BlockSpec((B, 4, Jp), lambda i, fid: (0, 0, 0)),
        ),
        compiler_params=pltpu.CompilerParams(
            dimension_semantics=("arbitrary",),
            vmem_limit_bytes=vmem_limit),
    )(frame_ids, pose_t)


# ----------------------------------------------------------------------------
# Module-equivalent wrapper
# ----------------------------------------------------------------------------
class LearnSkeletonPose:
    def __init__(self, num_frames, num_joints, learn=True, init_c2w=None,
                 type='quaternion', para_pose=None, use_tail=False):
        self.num_frames = num_frames
        self.num_joints = num_joints
        self.num_joints_padded = max(128, _round_up(num_joints, 128))
        self.use_tail = use_tail
        self.type = type
        self.tails = []
        self.if_pin = False
        self.pins = []
        self.pins_dict = {}
        self.init_c2w = init_c2w  # stored, unused in forward (as in torch)

        if type in ('euler', 'quaternion'):
            # torch init: zeros (num_frames, num_joints, 3); stored lane-dense
            # and sublane-aligned as (F, 8, J_pad).
            self._pose_t = jnp.zeros(
                (num_frames, 8, self.num_joints_padded), jnp.float32)
            self._pose_raw = None
        elif type == 'matrix':
            self._pose_t = None
            self._pose_raw = jnp.tile(jnp.eye(4, dtype=jnp.float32),
                                      (num_frames, num_joints, 1, 1))
        elif type == 'para_six':
            self._pose_t = None
            self._pose_raw = jnp.tile(
                jnp.asarray(para_pose, jnp.float32)[None], (num_frames, 1, 1))
        else:
            raise ValueError(type)

        # Device-cached tail mask (all-ones until set_tails is called).
        self._tail_mask = jnp.ones((1, num_joints), jnp.float32)

    # --- pose parameter exposed in the torch layout (F, J, 3) ----------------
    @property
    def pose(self):
        if self.type in ('euler', 'quaternion'):
            J = self.num_joints
            return jnp.transpose(self._pose_t[:, 0:3, :J], (0, 2, 1))
        return self._pose_raw

    @pose.setter
    def pose(self, value):
        value = jnp.asarray(value, jnp.float32)
        if self.type in ('euler', 'quaternion'):
            F, J = self.num_frames, self.num_joints
            buf = jnp.zeros((F, 8, self.num_joints_padded), jnp.float32)
            self._pose_t = buf.at[:, 0:3, :J].set(
                jnp.transpose(value, (0, 2, 1)))
        else:
            self._pose_raw = value

    # --- misc torch-module parity ---------------------------------------------
    def pin_mode(self, flag):
        self.if_pin = flag

    def set_pin(self, id, pose):
        self.pins.append(id)
        self.pins_dict[id] = pose

    def set_tails(self, tails):
        self.tails = list(tails)
        mask = np.ones((1, self.num_joints), np.float32)
        if not self.use_tail:
            for t in self.tails:
                mask[0, t] = 0.0
        self._tail_mask = jnp.asarray(mask)  # built once, lives on device

    # --- forward ---------------------------------------------------------------
    def forward_batch_lanes(self, frame_ids):
        """Quaternion-only: lane-dense (B, 4, J_pad) slab, no post-transpose."""
        assert self.type == 'quaternion'
        frame_ids = jnp.asarray(frame_ids, dtype=jnp.int32)
        return _quaternion_forward_lanes(self._pose_t, frame_ids)

    def forward_batch(self, frame_ids):
        """Batched lookup: frame_ids (B,) -> (B, J, 4) / (B, J, 3) torch layout."""
        frame_ids = jnp.asarray(frame_ids, dtype=jnp.int32)
        J = self.num_joints
        if self.type == 'euler':
            # Pure gather + one multiply: fused by XLA, no Pallas dispatch
            # (per performance review).
            gathered = self._pose_t[frame_ids, 0:3, :J]          # (B, 3, J)
            res = gathered * self._tail_mask                     # broadcast (1, J)
            return jnp.transpose(res, (0, 2, 1))                 # (B, J, 3)
        if self.type == 'para_six':
            return self._pose_raw[frame_ids]
        if self.type == 'matrix':
            # TODO(synk): torch forward mishandles 'matrix' (falls into the
            # quaternion branch with 4x4 blocks); raise instead of faking it.
            raise NotImplementedError("'matrix' pose type has no valid forward")
        # quaternion branch (the `if True:` path of the torch module)
        out = self.forward_batch_lanes(frame_ids)                # (B, 4, J_pad)
        return jnp.transpose(out[:, :, :J], (0, 2, 1))           # (B, J, 4)

    def forward(self, frame_id):
        """Single-frame lookup matching pose[frame_id].squeeze() semantics."""
        out = self.forward_batch(jnp.asarray([frame_id], dtype=jnp.int32))
        # jnp.squeeze also drops the joint axis when J == 1 (matches .squeeze()).
        return jnp.squeeze(out[0])

    __call__ = forward


# ----------------------------------------------------------------------------
# Pure-JAX / numpy references (for verification)
# ----------------------------------------------------------------------------
def _ref_quaternion(pose, frame_id):
    quat = pose[frame_id]
    norm2 = jnp.sum(quat * quat, axis=-1)
    ws = jnp.sqrt(jnp.maximum(1.0 - norm2, 0.0))[..., None]
    return jnp.concatenate([ws, quat], axis=-1)


def _ref_euler(pose, frame_id, tails, use_tail):
    res = np.array(pose[frame_id])
    if not use_tail:
        for t in tails:
            res[t] = 0.0
    return jnp.asarray(res)


if __name__ == "__main__":
    num_frames, num_joints = 8, 8
    key = jax.random.PRNGKey(0)
    k1, k2 = jax.random.split(key)
    frame_id = 3
    frame_ids = jnp.asarray([0, 3, 5, 7], jnp.int32)

    # ---- quaternion type (Pallas kernel) -------------------------------------
    quat_model = LearnSkeletonPose(num_frames, num_joints, type='quaternion')
    quat_pose = 0.1 * jax.random.normal(
        k1, (num_frames, num_joints, 3), jnp.float32)
    quat_model.pose = quat_pose

    q = jax.block_until_ready(quat_model(frame_id))
    q_ref = _ref_quaternion(quat_pose, frame_id)
    np.testing.assert_allclose(np.asarray(q), np.asarray(q_ref),
                               rtol=1e-6, atol=1e-6)

    qb = jax.block_until_ready(quat_model.forward_batch(frame_ids))
    qb_ref = jnp.stack([_ref_quaternion(quat_pose, int(f)) for f in frame_ids])
    np.testing.assert_allclose(np.asarray(qb), np.asarray(qb_ref),
                               rtol=1e-6, atol=1e-6)

    # lane-dense path (no post-transpose) gives the same data
    q_lanes = jax.block_until_ready(quat_model.forward_batch_lanes(frame_ids))
    np.testing.assert_allclose(
        np.asarray(jnp.transpose(q_lanes[:, :, :num_joints], (0, 2, 1))),
        np.asarray(qb_ref), rtol=1e-6, atol=1e-6)

    # ---- euler type with tail zeroing (fused XLA gather*mask) ----------------
    euler_model = LearnSkeletonPose(num_frames, num_joints, type='euler')
    euler_pose = 0.1 * jax.random.normal(
        k2, (num_frames, num_joints, 3), jnp.float32)
    euler_model.pose = euler_pose
    euler_model.set_tails([2, 5])

    e = jax.block_until_ready(euler_model(frame_id))
    e_ref = _ref_euler(euler_pose, frame_id, euler_model.tails,
                       euler_model.use_tail)
    np.testing.assert_allclose(np.asarray(e), np.asarray(e_ref),
                               rtol=1e-6, atol=1e-6)

    eb = jax.block_until_ready(euler_model.forward_batch(frame_ids))
    eb_ref = jnp.stack([_ref_euler(euler_pose, int(f), euler_model.tails,
                                   euler_model.use_tail) for f in frame_ids])
    np.testing.assert_allclose(np.asarray(eb), np.asarray(eb_ref),
                               rtol=1e-6, atol=1e-6)

    print("KERNEL_OK")
</pallas_src>

<mosaic_0001>
module attributes {stable_mosaic.version = 11 : i64} {
  func.func @_quaternion_kernel(%arg0: i32, %arg1: memref<1xi32, #tpu.memory_space<smem>>, %arg2: memref<8x8x128xf32, #tpu.memory_space<vmem>>, %arg3: memref<1x4x128xf32, #tpu.memory_space<vmem>>) attributes {dimension_semantics = [#tpu.dimension_semantics<arbitrary>], iteration_bounds = array<i64: 1>, scalar_prefetch = 1 : i64, scratch_operands = 0 : i64, tpu.core_type = #tpu.core_type<tc>, window_params = [{pipeline_mode = #tpu.pipeline_mode<synchronous>, transform_indices = @transform_0, window_bounds = array<i64: 8, 8, 128>}, {pipeline_mode = #tpu.pipeline_mode<synchronous>, transform_indices = @transform_1, window_bounds = array<i64: 1, 4, 128>}]} {
    %c0 = arith.constant 0 : index
    %0 = memref.load %arg1[%c0] : memref<1xi32, #tpu.memory_space<smem>>
    %c0_i32 = arith.constant 0 : i32
    %c7_i32 = arith.constant 7 : i32
    %1 = arith.maxsi %c0_i32, %0 : i32
    %2 = arith.minsi %c7_i32, %1 : i32
    %3 = arith.index_cast %2 : i32 to index
    %c0_0 = arith.constant 0 : index
    %c0_1 = arith.constant 0 : index
    %4 = vector.load %arg2[%3, %c0_0, %c0_1] : memref<8x8x128xf32, #tpu.memory_space<vmem>>, vector<1x8x128xf32>
    %5 = vector.shape_cast %4 : vector<1x8x128xf32> to vector<8x128xf32>
    %6 = vector.extract_strided_slice %5 {offsets = [0, 0], sizes = [3, 128], strides = [1, 1]} : vector<8x128xf32> to vector<3x128xf32>
    %7 = vector.extract_strided_slice %6 {offsets = [0, 0], sizes = [1, 128], strides = [1, 1]} : vector<3x128xf32> to vector<1x128xf32>
    %8 = vector.extract_strided_slice %6 {offsets = [0, 0], sizes = [1, 128], strides = [1, 1]} : vector<3x128xf32> to vector<1x128xf32>
    %9 = arith.mulf %7, %8 : vector<1x128xf32>
    %10 = vector.extract_strided_slice %6 {offsets = [1, 0], sizes = [1, 128], strides = [1, 1]} : vector<3x128xf32> to vector<1x128xf32>
    %11 = vector.extract_strided_slice %6 {offsets = [1, 0], sizes = [1, 128], strides = [1, 1]} : vector<3x128xf32> to vector<1x128xf32>
    %12 = arith.mulf %10, %11 : vector<1x128xf32>
    %13 = arith.addf %9, %12 : vector<1x128xf32>
    %14 = vector.extract_strided_slice %6 {offsets = [2, 0], sizes = [1, 128], strides = [1, 1]} : vector<3x128xf32> to vector<1x128xf32>
    %15 = vector.extract_strided_slice %6 {offsets = [2, 0], sizes = [1, 128], strides = [1, 1]} : vector<3x128xf32> to vector<1x128xf32>
    %16 = arith.mulf %14, %15 : vector<1x128xf32>
    %17 = arith.addf %13, %16 : vector<1x128xf32>
    %cst = arith.constant 1.000000e+00 : f32
    %18 = vector.broadcast %cst : f32 to vector<1x128xf32>
    %19 = arith.subf %18, %17 : vector<1x128xf32>
    %cst_2 = arith.constant 0.000000e+00 : f32
    %20 = vector.broadcast %cst_2 : f32 to vector<1x128xf32>
    %21 = arith.maximumf %19, %20 : vector<1x128xf32>
    %22 = math.sqrt %21 : vector<1x128xf32>
    %c0_3 = arith.constant 0 : index
    %c0_4 = arith.constant 0 : index
    %c0_5 = arith.constant 0 : index
    %23 = vector.load %arg3[%c0_3, %c0_4, %c0_5] : memref<1x4x128xf32, #tpu.memory_space<vmem>>, vector<1x1x128xf32>
    %24 = vector.shape_cast %23 : vector<1x1x128xf32> to vector<1x128xf32>
    %25 = vector.shape_cast %22 : vector<1x128xf32> to vector<1x1x128xf32>
    tpu.vector_store %arg3[%c0_3, %c0_4, %c0_5], %25 {strides = array<i32>} : memref<1x4x128xf32, #tpu.memory_space<vmem>>, vector<1x1x128xf32>,
    %c0_6 = arith.constant 0 : index
    %c1 = arith.constant 1 : index
    %c0_7 = arith.constant 0 : index
    %26 = vector.load %arg3[%c0_6, %c1, %c0_7] : memref<1x4x128xf32, #tpu.memory_space<vmem>>, vector<1x3x128xf32>
    %27 = vector.shape_cast %26 : vector<1x3x128xf32> to vector<3x128xf32>
    %28 = vector.shape_cast %6 : vector<3x128xf32> to vector<1x3x128xf32>
    tpu.vector_store %arg3[%c0_6, %c1, %c0_7], %28 {strides = array<i32>} : memref<1x4x128xf32, #tpu.memory_space<vmem>>, vector<1x3x128xf32>,
    return
  }
  func.func @transform_0(%arg0: i32, %arg1: memref<1xi32, #tpu.memory_space<smem>>) -> (i32, i32, i32) {
    %c0_i32 = arith.constant 0 : i32
    %c0_i32_0 = arith.constant 0 : i32
    %c0_i32_1 = arith.constant 0 : i32
    %c0_i32_2 = arith.constant 0 : i32
    return %c0_i32, %c0_i32_0, %c0_i32_1 : i32, i32, i32
  }
  func.func @transform_1(%arg0: i32, %arg1: memref<1xi32, #tpu.memory_space<smem>>) -> (i32, i32, i32) {
    %c0_i32 = arith.constant 0 : i32
    %c0_i32_0 = arith.constant 0 : i32
    %c0_i32_1 = arith.constant 0 : i32
    %c0_i32_2 = arith.constant 0 : i32
    return %c0_i32, %c0_i32_0, %c0_i32_1 : i32, i32, i32
  }
}

</mosaic_0001>

<bundles_post_ra>
// kernel: _quaternion_forward_lanes.1
= control target key start
LH: loop header
LB: loop body
LE: loop exit
PB: predicated region body
PF: predicated region fallthrough
CT: control target
= control target key end

     0   :  { %8 = vsyncpa [#allocation5], 0  ;;  %s178_s0 = inlined_call_operand.<no memory space> [shape: s32[1], index: 0, kind: input, shape index: {}]   ;;  %s179_s1 = inlined_call_operand.hbm [shape: f32[8,8,128], index: 1, kind: input, shape index: {}]   ;;  %s180_s2 = inlined_call_operand.hbm [shape: f32[1,4,128], index: 2, kind: output, shape index: {}]  }
   0x1   :  { %9 = vsyncpa [#allocation6], 0  ;;  %s14_s11 = sshll.u32 %s179_s1, 4  ;;  %s144_s12 = smov [#allocation4]   ;;  %s15_s11 = int_to_ptr.hbm [resolvable:$true] %s14_s11 }
   0x2   :  { %s16_s13 = sshll.u32 %s144_s12, 4  ;;  %s145_s14 = smov 128   ;;  %s17_s13 = int_to_ptr.vmem [resolvable:$true] %s16_s13 }
   0x3   :  { %s146_s15 = smov 8  }
   0x4   :  { %22 = dma.hbm_to_vmem [thread:$0]  %s15_s11, 1024, %s17_s13, [#allocation5], %s145_s14, %s145_s14, %s146_s15  }
   0x5   :  { %140 = dma.done.wait [#allocation5], 1024  }
   0x6   :  { %141 = vsyncadd [#allocation5], 4294966272  ;;  %p28_p0 = scmp.gt.s32.totalorder %s178_s0, 0  ;;  %p78_p1 = scmp.lt.s32.totalorder %s178_s0, 7 }
   0x7   :  { %s66_s26 = sshll.u32 %s180_s2, 4  ;;  %s67_s26 = int_to_ptr.hbm [resolvable:$true] %s66_s26 }
   0x8   :  { %s182_s0 = smov (!%p28_p0, %s178_s0), 0 }
   0x9   :  { %s184_s0 = smov (!%p78_p1, %s182_s0), 7 }
   0xa   :  { %s83_s1 = sshll.u32 %s184_s0, 3  ;;  %s147_s0 = smov [#allocation7]  }
   0xb   :  { %s33_s22 = scalar_lea.vmem [#allocation4], %s83_s1  ;;  %s64_s23 = sshll.u32 %s147_s0, 4  ;;  %s65_s23 = int_to_ptr.vmem [resolvable:$true] %s64_s23 }
   0xc   :  { %v34_v0 = vld [vmem:[%s33_s22] sm:$0xff] }
   0xd   :  { %v35_v1 = vmul.f32 %v34_v0, %v34_v0  ;;  %58 = vst [vmem:[#allocation7 + $0x1] sm:$0x7] %v34_v0 }
   0xf   :  { %v37_v2 = vrot.slane %v35_v1, 1  ;;  %v40_v3 = vrot.slane %v35_v1, 2 }
  0x11   :  { %v39_v4 = vadd.f32 %v37_v2, %v35_v1 }
  0x13   :  { %v42_v5 = vadd.f32 %v40_v3, %v39_v4 }
  0x15   :  { %v43_v6 = vsub.f32 1.0, %v42_v5 }
  0x17   :  { %v44_v7 = vmax.f32 %v43_v6, 0.0 }
  0x19   :  { %90 = vrsqrt.f32 %v44_v7  ;;  %vm52_vm0 = vcmp.eq.f32.partialorder %v44_v7, inf  ;;  %v55_v14 = vand.u32 2147483648, %v44_v7  ;;  %vm54_vm1 = vcmp.eq.f32.partialorder %v44_v7, 0.0 }
  0x1f   :  { %v91_v8 = vpop.eup %90 }
  0x20   :  { %v46_v9 = vmul.f32 %v91_v8, %v44_v7 }
  0x22   :  { %v47_v10 = vmul.f32 %v91_v8, %v46_v9 }
  0x24   :  { %v48_v11 = vmul.f32 0.5, %v47_v10 }
  0x26   :  { %v49_v12 = vsub.f32 1.5, %v48_v11 }
  0x28   :  { %v50_v13 = vmul.f32 %v91_v8, %v49_v12 }
  0x2a   :  { %v51_v15 = vmul.f32 %v50_v13, %v44_v7 }
  0x2c   :  { %v53_v16 = vsel %vm52_vm0, %v44_v7, %v51_v15 }
  0x2d   :  { %v56_v17 = vsel %vm54_vm1, %v55_v14, %v53_v16 }
  0x2e   :  { %57 = vst [vmem:[#allocation7] sm:$0x1] %v56_v17 }
  0x2f   :  { %69 = dma.vmem_to_hbm [thread:$0]  %s65_s23, 64, %s67_s26, [#allocation6]  }
  0x30   :  { %142 = dma.done.wait [#allocation6], 64  }
  0x31   :  { %143 = vsyncadd [#allocation6], 4294967232 }
  0x32   :  { %74 = vsyncpa [#allocation5], 1 }
  0x33   :  { %75 = vsyncpa [#allocation6], 1 }

</bundles_post_ra>
